<compile_context>
chip_gen: v7x
topology: tpu7x:2x2x1
jax: 0.10.0
libtpu: 0.0.40
codegen_flags: <defaults>
</compile_context>

<pallas_src>
import functools

import jax
import jax.numpy as jnp
from jax import lax
from jax.experimental import pallas as pl
from jax.experimental.pallas import tpu as pltpu


def decoder_layer_kernel(
    x_ref,
    wqkv_ref, bqkv_ref,
    wo_ref, bo_ref,
    w1_ref, b1_ref,
    w2_ref, b2_ref,
    out_ref,
    *,
    batch: int,
    seq_len: int,
    num_heads: int,
    key_size: int,
):
    f32 = jnp.float32
    bf16 = jnp.bfloat16
    B, S, H, K = batch, seq_len, num_heads, key_size
    HK = H * K

    x = x_ref[...]                                   # (B*S, D) f32
    xb = x.astype(bf16)

    # --- Fused Q/K/V projection: one lane-dense GEMM, f32 accumulation ------
    qkv = jnp.dot(xb, wqkv_ref[...], preferred_element_type=f32) + bqkv_ref[...]
    q = qkv[:, 0:HK] * (K ** -0.5)                   # fold 1/sqrt(K) into q (f32)
    k = qkv[:, HK:2 * HK]
    v = qkv[:, 2 * HK:3 * HK]

    # Causal mask shared across batches/heads.  Large finite negative (not
    # -inf) so a fully masked row still softmaxes to a well-defined value.
    row = lax.broadcasted_iota(jnp.int32, (S, S), 0)
    col = lax.broadcasted_iota(jnp.int32, (S, S), 1)
    causal = col > row
    neg = f32(-1e30)

    dn_qkT = (((1,), (1,)), ((), ()))                # (S,K) x (S,K) -> (S,S)

    # --- Attention core: static loops over (batch, head) lane/sublane slices.
    # Each per-head score matmul is inherently (S,K)x(K,S); batching over H in
    # a single dot_general would still be H separate MXU pushes, so static
    # slicing is layout-equivalent and avoids any head-axis relayout.
    ctx_rows = []
    for b in range(B):
        r0 = b * S
        head_ctx = []
        for h in range(H):
            c0 = h * K
            qh = q[r0:r0 + S, c0:c0 + K].astype(bf16)
            kh = k[r0:r0 + S, c0:c0 + K].astype(bf16)
            vh = v[r0:r0 + S, c0:c0 + K].astype(bf16)

            s = lax.dot_general(qh, kh, dn_qkT, preferred_element_type=f32)
            s = jnp.where(causal, neg, s)

            m = jnp.max(s, axis=-1, keepdims=True)
            p = jnp.exp(s - m)
            denom = jnp.sum(p, axis=-1, keepdims=True)
            probs = p * pl.reciprocal(denom, approx=True)

            head_ctx.append(
                jnp.dot(probs.astype(bf16), vh, preferred_element_type=f32))
        ctx_rows.append(jnp.concatenate(head_ctx, axis=1))    # (S, HK)
    ctx = jnp.concatenate(ctx_rows, axis=0)                    # (B*S, HK)

    # --- Output projection: single GEMM; head reduction inside the MXU ------
    attn = jnp.dot(ctx.astype(bf16), wo_ref[...],
                   preferred_element_type=f32) + bo_ref[...]   # (B*S, D)

    x1 = x + attn                                              # residual 1 (f32)

    # --- Feed-forward: Linear -> ReLU -> Linear, bf16 matmuls / f32 acc -----
    h1 = jnp.dot(x1.astype(bf16), w1_ref[...], preferred_element_type=f32) + b1_ref[...]
    h1 = jnp.maximum(h1, 0.0)
    ff = jnp.dot(h1.astype(bf16), w2_ref[...], preferred_element_type=f32) + b2_ref[...]

    out_ref[...] = x1 + ff                                     # residual 2


def pack_params(params, compute_dtype=jnp.bfloat16):
    """One-time weight re-layout (call at load time, reuse across forwards).

    PyTorch nn.Linear layout is W (out, in), b (out,).  Packed layout:
      wqkv (D, 3*H*K) bf16, wo (H*K, D) bf16, w1 (D, F) bf16, w2 (F, D) bf16,
      biases as f32 (1, N) lane rows.
    """
    D = params["wq"].shape[1]
    HK = params["wq"].shape[0]
    F = params["w1"].shape[0]
    wqkv = jnp.concatenate(
        [params["wq"].T, params["wk"].T, params["wv"].T], axis=1
    ).astype(compute_dtype)                                    # (D, 3HK)
    bqkv = jnp.concatenate(
        [params["bq"], params["bk"], params["bv"]]
    ).reshape(1, 3 * HK).astype(jnp.float32)
    return dict(
        wqkv=wqkv, bqkv=bqkv,
        wo=params["wo"].T.astype(compute_dtype),               # (HK, D)
        bo=params["bo"].reshape(1, D).astype(jnp.float32),
        w1=params["w1"].T.astype(compute_dtype),               # (D, F)
        b1=params["b1"].reshape(1, F).astype(jnp.float32),
        w2=params["w2"].T.astype(compute_dtype),               # (F, D)
        b2=params["b2"].reshape(1, D).astype(jnp.float32),
    )


def transformer_decoder_layer(x, packed, *, num_heads, key_size):
    """x: (B, S, D) float32.  packed: output of pack_params()."""
    B, S, D = x.shape

    kernel = functools.partial(
        decoder_layer_kernel,
        batch=B, seq_len=S, num_heads=num_heads, key_size=key_size)

    # Flatten (B, S, D) -> (B*S, D) in the wrapper (layout no-op in XLA) so the
    # whole layer is a single grid step: every operand is DMA'd exactly once
    # into a single VMEM buffer (no double-buffering of the constant weights,
    # no per-grid-step overhead on single-TC chips).
    x2d = x.reshape(B * S, D)

    vmem_spec = pl.BlockSpec(memory_space=pltpu.MemorySpace.VMEM)

    out2d = pl.pallas_call(
        kernel,
        out_shape=jax.ShapeDtypeStruct((B * S, D), jnp.float32),
        in_specs=[vmem_spec] * 9,
        out_specs=vmem_spec,
        # Total resident footprint here is < 1 MiB; at realistic D/S/F set
        # pltpu.CompilerParams(vmem_limit_bytes=...) and tile flash-style.
    )(
        x2d,
        packed["wqkv"], packed["bqkv"],
        packed["wo"], packed["bo"],
        packed["w1"], packed["b1"],
        packed["w2"], packed["b2"],
    )
    return out2d.reshape(B, S, D)


def init_params(key, model_dim, num_heads, key_size, ff_dim):
    """Deterministic synthetic init in PyTorch nn.Linear layout: W (out, in), b (out,)."""
    HK = num_heads * key_size
    ks = jax.random.split(key, 12)

    def lin(kw, kb, fan_in, fan_out):
        bound = 1.0 / jnp.sqrt(jnp.float32(fan_in))
        w = jax.random.uniform(kw, (fan_out, fan_in), jnp.float32, -bound, bound)
        b = jax.random.uniform(kb, (fan_out,), jnp.float32, -bound, bound)
        return w, b

    wq, bq = lin(ks[0], ks[1], model_dim, HK)
    wk, bk = lin(ks[2], ks[3], model_dim, HK)
    wv, bv = lin(ks[4], ks[5], model_dim, HK)
    wo, bo = lin(ks[6], ks[7], HK, model_dim)
    w1, b1 = lin(ks[8], ks[9], model_dim, ff_dim)
    w2, b2 = lin(ks[10], ks[11], ff_dim, model_dim)

    return dict(wq=wq, bq=bq, wk=wk, bk=bk, wv=wv, bv=bv,
                wo=wo, bo=bo, w1=w1, b1=b1, w2=w2, b2=b2)


def reference(x, p, *, num_heads, key_size):
    """Pure-JAX (f32) reference mirroring the PyTorch forward."""
    B, S, D = x.shape
    H, K = num_heads, key_size
    lin = lambda t, w, b: t @ w.T + b
    q = lin(x, p["wq"], p["bq"]).reshape(B, S, H, K).transpose(0, 2, 1, 3)
    k = lin(x, p["wk"], p["bk"]).reshape(B, S, H, K).transpose(0, 2, 1, 3)
    v = lin(x, p["wv"], p["bv"]).reshape(B, S, H, K).transpose(0, 2, 1, 3)
    scores = jnp.einsum("bhqd,bhkd->bhqk", q, k) / jnp.sqrt(jnp.float32(K))
    mask = jnp.triu(jnp.ones((S, S), bool), k=1)
    scores = jnp.where(mask, -jnp.inf, scores)
    probs = jax.nn.softmax(scores, axis=-1)
    attn = jnp.einsum("bhqk,bhkd->bhqd", probs, v).transpose(0, 2, 1, 3).reshape(B, S, H * K)
    x1 = x + lin(attn, p["wo"], p["bo"])
    ff = lin(jnp.maximum(lin(x1, p["w1"], p["b1"]), 0.0), p["w2"], p["b2"])
    return x1 + ff


if __name__ == "__main__":
    # Small shapes consistent with the module.
    batch, seq_len = 2, 8
    model_dim, num_heads, key_size, ff_dim = 32, 4, 8, 64

    key = jax.random.PRNGKey(0)
    kx, kp = jax.random.split(key)
    x = jax.random.normal(kx, (batch, seq_len, model_dim), jnp.float32)
    params = init_params(kp, model_dim, num_heads, key_size, ff_dim)

    # Hoisted weight packing: transposes / concats / bf16 casts run once here,
    # not per forward call.
    packed = pack_params(params)

    out = transformer_decoder_layer(x, packed, num_heads=num_heads, key_size=key_size)
    out = jax.block_until_ready(out)

    ref = reference(x, params, num_heads=num_heads, key_size=key_size)
    assert out.shape == (batch, seq_len, model_dim)
    max_err = float(jnp.max(jnp.abs(out - ref)))
    # bf16 matmul inputs with f32 accumulation vs a pure-f32 reference.
    assert jnp.allclose(out, ref, atol=5e-2, rtol=5e-2), (
        f"mismatch vs reference (max abs err {max_err})")

    print("KERNEL_OK")
</pallas_src>

<mosaic_0001>
module attributes {stable_mosaic.version = 11 : i64} {
  func.func @decoder_layer_kernel(%arg0: memref<16x32xf32, #tpu.memory_space<vmem>>, %arg1: memref<32x96xbf16, #tpu.memory_space<vmem>>, %arg2: memref<1x96xf32, #tpu.memory_space<vmem>>, %arg3: memref<32x32xbf16, #tpu.memory_space<vmem>>, %arg4: memref<1x32xf32, #tpu.memory_space<vmem>>, %arg5: memref<32x64xbf16, #tpu.memory_space<vmem>>, %arg6: memref<1x64xf32, #tpu.memory_space<vmem>>, %arg7: memref<64x32xbf16, #tpu.memory_space<vmem>>, %arg8: memref<1x32xf32, #tpu.memory_space<vmem>>, %arg9: memref<16x32xf32, #tpu.memory_space<vmem>>) attributes {dimension_semantics = [], scalar_prefetch = 0 : i64, scratch_operands = 0 : i64, tpu.core_type = #tpu.core_type<tc>} {
    %c0 = arith.constant 0 : index
    %c0_0 = arith.constant 0 : index
    %0 = vector.load %arg0[%c0, %c0_0] : memref<16x32xf32, #tpu.memory_space<vmem>>, vector<16x32xf32>
    %1 = arith.truncf %0 : vector<16x32xf32> to vector<16x32xbf16>
    %c0_1 = arith.constant 0 : index
    %c0_2 = arith.constant 0 : index
    %2 = vector.load %arg1[%c0_1, %c0_2] : memref<32x96xbf16, #tpu.memory_space<vmem>>, vector<32x96xbf16>
    %cst = arith.constant dense<0.000000e+00> : vector<16x96xf32>
    %3 = tpu.matmul %1, %2, %cst {dimension_numbers = #tpu.dot_dimension_numbers<[1], [0], [0], [1], [0, 0, 1, 1], [], []>} : vector<16x32xbf16>, vector<32x96xbf16>, vector<16x96xf32> -> vector<16x96xf32>
    %c0_3 = arith.constant 0 : index
    %c0_4 = arith.constant 0 : index
    %4 = vector.load %arg2[%c0_3, %c0_4] : memref<1x96xf32, #tpu.memory_space<vmem>>, vector<1x96xf32>
    %5 = vector.broadcast %4 : vector<1x96xf32> to vector<16x96xf32>
    %6 = arith.addf %3, %5 : vector<16x96xf32>
    %7 = vector.extract_strided_slice %6 {offsets = [0, 0], sizes = [16, 32], strides = [1, 1]} : vector<16x96xf32> to vector<16x32xf32>
    %cst_5 = arith.constant 0.353553385 : f32
    %8 = vector.broadcast %cst_5 : f32 to vector<16x32xf32>
    %9 = arith.mulf %7, %8 : vector<16x32xf32>
    %10 = vector.extract_strided_slice %6 {offsets = [0, 32], sizes = [16, 32], strides = [1, 1]} : vector<16x96xf32> to vector<16x32xf32>
    %11 = vector.extract_strided_slice %6 {offsets = [0, 64], sizes = [16, 32], strides = [1, 1]} : vector<16x96xf32> to vector<16x32xf32>
    %12 = tpu.iota {dimensions = array<i32: 0>} : vector<8x8xi32>
    %13 = tpu.iota {dimensions = array<i32: 1>} : vector<8x8xi32>
    %14 = arith.cmpi sgt, %13, %12 : vector<8x8xi32>
    %15 = vector.extract_strided_slice %9 {offsets = [0, 0], sizes = [8, 8], strides = [1, 1]} : vector<16x32xf32> to vector<8x8xf32>
    %16 = arith.truncf %15 : vector<8x8xf32> to vector<8x8xbf16>
    %17 = vector.extract_strided_slice %10 {offsets = [0, 0], sizes = [8, 8], strides = [1, 1]} : vector<16x32xf32> to vector<8x8xf32>
    %18 = arith.truncf %17 : vector<8x8xf32> to vector<8x8xbf16>
    %19 = vector.extract_strided_slice %11 {offsets = [0, 0], sizes = [8, 8], strides = [1, 1]} : vector<16x32xf32> to vector<8x8xf32>
    %20 = arith.truncf %19 : vector<8x8xf32> to vector<8x8xbf16>
    %cst_6 = arith.constant dense<0.000000e+00> : vector<8x8xf32>
    %21 = tpu.matmul %16, %18, %cst_6 {dimension_numbers = #tpu.dot_dimension_numbers<[1], [1], [0], [0], [0, 0, 1, 0], [], []>} : vector<8x8xbf16>, vector<8x8xbf16>, vector<8x8xf32> -> vector<8x8xf32>
    %cst_7 = arith.constant -1.000000e+30 : f32
    %22 = vector.broadcast %cst_7 : f32 to vector<8x8xf32>
    %23 = arith.select %14, %22, %21 : vector<8x8xi1>, vector<8x8xf32>
    %cst_8 = arith.constant dense<0xFF800000> : vector<8xf32>
    %24 = vector.multi_reduction <maximumf>, %23, %cst_8 [1] : vector<8x8xf32> to vector<8xf32>
    %25 = vector.shape_cast %24 : vector<8xf32> to vector<8x1xf32>
    %26 = vector.broadcast %25 : vector<8x1xf32> to vector<8x8xf32>
    %27 = arith.subf %23, %26 : vector<8x8xf32>
    %28 = math.exp %27 : vector<8x8xf32>
    %cst_9 = arith.constant dense<0.000000e+00> : vector<8xf32>
    %29 = vector.multi_reduction <add>, %28, %cst_9 [1] : vector<8x8xf32> to vector<8xf32>
    %30 = vector.shape_cast %29 : vector<8xf32> to vector<8x1xf32>
    %31 = tpu.reciprocal %30 {approx = true} : vector<8x1xf32> -> vector<8x1xf32>
    %32 = vector.broadcast %31 : vector<8x1xf32> to vector<8x8xf32>
    %33 = arith.mulf %28, %32 : vector<8x8xf32>
    %34 = arith.truncf %33 : vector<8x8xf32> to vector<8x8xbf16>
    %cst_10 = arith.constant dense<0.000000e+00> : vector<8x8xf32>
    %35 = tpu.matmul %34, %20, %cst_10 {dimension_numbers = #tpu.dot_dimension_numbers<[1], [0], [0], [1], [0, 0, 1, 1], [], []>} : vector<8x8xbf16>, vector<8x8xbf16>, vector<8x8xf32> -> vector<8x8xf32>
    %36 = vector.extract_strided_slice %9 {offsets = [0, 8], sizes = [8, 8], strides = [1, 1]} : vector<16x32xf32> to vector<8x8xf32>
    %37 = arith.truncf %36 : vector<8x8xf32> to vector<8x8xbf16>
    %38 = vector.extract_strided_slice %10 {offsets = [0, 8], sizes = [8, 8], strides = [1, 1]} : vector<16x32xf32> to vector<8x8xf32>
    %39 = arith.truncf %38 : vector<8x8xf32> to vector<8x8xbf16>
    %40 = vector.extract_strided_slice %11 {offsets = [0, 8], sizes = [8, 8], strides = [1, 1]} : vector<16x32xf32> to vector<8x8xf32>
    %41 = arith.truncf %40 : vector<8x8xf32> to vector<8x8xbf16>
    %cst_11 = arith.constant dense<0.000000e+00> : vector<8x8xf32>
    %42 = tpu.matmul %37, %39, %cst_11 {dimension_numbers = #tpu.dot_dimension_numbers<[1], [1], [0], [0], [0, 0, 1, 0], [], []>} : vector<8x8xbf16>, vector<8x8xbf16>, vector<8x8xf32> -> vector<8x8xf32>
    %cst_12 = arith.constant -1.000000e+30 : f32
    %43 = vector.broadcast %cst_12 : f32 to vector<8x8xf32>
    %44 = arith.select %14, %43, %42 : vector<8x8xi1>, vector<8x8xf32>
    %cst_13 = arith.constant dense<0xFF800000> : vector<8xf32>
    %45 = vector.multi_reduction <maximumf>, %44, %cst_13 [1] : vector<8x8xf32> to vector<8xf32>
    %46 = vector.shape_cast %45 : vector<8xf32> to vector<8x1xf32>
    %47 = vector.broadcast %46 : vector<8x1xf32> to vector<8x8xf32>
    %48 = arith.subf %44, %47 : vector<8x8xf32>
    %49 = math.exp %48 : vector<8x8xf32>
    %cst_14 = arith.constant dense<0.000000e+00> : vector<8xf32>
    %50 = vector.multi_reduction <add>, %49, %cst_14 [1] : vector<8x8xf32> to vector<8xf32>
    %51 = vector.shape_cast %50 : vector<8xf32> to vector<8x1xf32>
    %52 = tpu.reciprocal %51 {approx = true} : vector<8x1xf32> -> vector<8x1xf32>
    %53 = vector.broadcast %52 : vector<8x1xf32> to vector<8x8xf32>
    %54 = arith.mulf %49, %53 : vector<8x8xf32>
    %55 = arith.truncf %54 : vector<8x8xf32> to vector<8x8xbf16>
    %cst_15 = arith.constant dense<0.000000e+00> : vector<8x8xf32>
    %56 = tpu.matmul %55, %41, %cst_15 {dimension_numbers = #tpu.dot_dimension_numbers<[1], [0], [0], [1], [0, 0, 1, 1], [], []>} : vector<8x8xbf16>, vector<8x8xbf16>, vector<8x8xf32> -> vector<8x8xf32>
    %57 = vector.extract_strided_slice %9 {offsets = [0, 16], sizes = [8, 8], strides = [1, 1]} : vector<16x32xf32> to vector<8x8xf32>
    %58 = arith.truncf %57 : vector<8x8xf32> to vector<8x8xbf16>
    %59 = vector.extract_strided_slice %10 {offsets = [0, 16], sizes = [8, 8], strides = [1, 1]} : vector<16x32xf32> to vector<8x8xf32>
    %60 = arith.truncf %59 : vector<8x8xf32> to vector<8x8xbf16>
    %61 = vector.extract_strided_slice %11 {offsets = [0, 16], sizes = [8, 8], strides = [1, 1]} : vector<16x32xf32> to vector<8x8xf32>
    %62 = arith.truncf %61 : vector<8x8xf32> to vector<8x8xbf16>
    %cst_16 = arith.constant dense<0.000000e+00> : vector<8x8xf32>
    %63 = tpu.matmul %58, %60, %cst_16 {dimension_numbers = #tpu.dot_dimension_numbers<[1], [1], [0], [0], [0, 0, 1, 0], [], []>} : vector<8x8xbf16>, vector<8x8xbf16>, vector<8x8xf32> -> vector<8x8xf32>
    %cst_17 = arith.constant -1.000000e+30 : f32
    %64 = vector.broadcast %cst_17 : f32 to vector<8x8xf32>
    %65 = arith.select %14, %64, %63 : vector<8x8xi1>, vector<8x8xf32>
    %cst_18 = arith.constant dense<0xFF800000> : vector<8xf32>
    %66 = vector.multi_reduction <maximumf>, %65, %cst_18 [1] : vector<8x8xf32> to vector<8xf32>
    %67 = vector.shape_cast %66 : vector<8xf32> to vector<8x1xf32>
    %68 = vector.broadcast %67 : vector<8x1xf32> to vector<8x8xf32>
    %69 = arith.subf %65, %68 : vector<8x8xf32>
    %70 = math.exp %69 : vector<8x8xf32>
    %cst_19 = arith.constant dense<0.000000e+00> : vector<8xf32>
    %71 = vector.multi_reduction <add>, %70, %cst_19 [1] : vector<8x8xf32> to vector<8xf32>
    %72 = vector.shape_cast %71 : vector<8xf32> to vector<8x1xf32>
    %73 = tpu.reciprocal %72 {approx = true} : vector<8x1xf32> -> vector<8x1xf32>
    %74 = vector.broadcast %73 : vector<8x1xf32> to vector<8x8xf32>
    %75 = arith.mulf %70, %74 : vector<8x8xf32>
    %76 = arith.truncf %75 : vector<8x8xf32> to vector<8x8xbf16>
    %cst_20 = arith.constant dense<0.000000e+00> : vector<8x8xf32>
    %77 = tpu.matmul %76, %62, %cst_20 {dimension_numbers = #tpu.dot_dimension_numbers<[1], [0], [0], [1], [0, 0, 1, 1], [], []>} : vector<8x8xbf16>, vector<8x8xbf16>, vector<8x8xf32> -> vector<8x8xf32>
    %78 = vector.extract_strided_slice %9 {offsets = [0, 24], sizes = [8, 8], strides = [1, 1]} : vector<16x32xf32> to vector<8x8xf32>
    %79 = arith.truncf %78 : vector<8x8xf32> to vector<8x8xbf16>
    %80 = vector.extract_strided_slice %10 {offsets = [0, 24], sizes = [8, 8], strides = [1, 1]} : vector<16x32xf32> to vector<8x8xf32>
    %81 = arith.truncf %80 : vector<8x8xf32> to vector<8x8xbf16>
    %82 = vector.extract_strided_slice %11 {offsets = [0, 24], sizes = [8, 8], strides = [1, 1]} : vector<16x32xf32> to vector<8x8xf32>
    %83 = arith.truncf %82 : vector<8x8xf32> to vector<8x8xbf16>
    %cst_21 = arith.constant dense<0.000000e+00> : vector<8x8xf32>
    %84 = tpu.matmul %79, %81, %cst_21 {dimension_numbers = #tpu.dot_dimension_numbers<[1], [1], [0], [0], [0, 0, 1, 0], [], []>} : vector<8x8xbf16>, vector<8x8xbf16>, vector<8x8xf32> -> vector<8x8xf32>
    %cst_22 = arith.constant -1.000000e+30 : f32
    %85 = vector.broadcast %cst_22 : f32 to vector<8x8xf32>
    %86 = arith.select %14, %85, %84 : vector<8x8xi1>, vector<8x8xf32>
    %cst_23 = arith.constant dense<0xFF800000> : vector<8xf32>
    %87 = vector.multi_reduction <maximumf>, %86, %cst_23 [1] : vector<8x8xf32> to vector<8xf32>
    %88 = vector.shape_cast %87 : vector<8xf32> to vector<8x1xf32>
    %89 = vector.broadcast %88 : vector<8x1xf32> to vector<8x8xf32>
    %90 = arith.subf %86, %89 : vector<8x8xf32>
    %91 = math.exp %90 : vector<8x8xf32>
    %cst_24 = arith.constant dense<0.000000e+00> : vector<8xf32>
    %92 = vector.multi_reduction <add>, %91, %cst_24 [1] : vector<8x8xf32> to vector<8xf32>
    %93 = vector.shape_cast %92 : vector<8xf32> to vector<8x1xf32>
    %94 = tpu.reciprocal %93 {approx = true} : vector<8x1xf32> -> vector<8x1xf32>
    %95 = vector.broadcast %94 : vector<8x1xf32> to vector<8x8xf32>
    %96 = arith.mulf %91, %95 : vector<8x8xf32>
    %97 = arith.truncf %96 : vector<8x8xf32> to vector<8x8xbf16>
    %cst_25 = arith.constant dense<0.000000e+00> : vector<8x8xf32>
    %98 = tpu.matmul %97, %83, %cst_25 {dimension_numbers = #tpu.dot_dimension_numbers<[1], [0], [0], [1], [0, 0, 1, 1], [], []>} : vector<8x8xbf16>, vector<8x8xbf16>, vector<8x8xf32> -> vector<8x8xf32>
    %99 = tpu.concatenate %35, %56, %77, %98 in 1 : vector<8x8xf32>, vector<8x8xf32>, vector<8x8xf32>, vector<8x8xf32> -> vector<8x32xf32>
    %100 = vector.extract_strided_slice %9 {offsets = [8, 0], sizes = [8, 8], strides = [1, 1]} : vector<16x32xf32> to vector<8x8xf32>
    %101 = arith.truncf %100 : vector<8x8xf32> to vector<8x8xbf16>
    %102 = vector.extract_strided_slice %10 {offsets = [8, 0], sizes = [8, 8], strides = [1, 1]} : vector<16x32xf32> to vector<8x8xf32>
    %103 = arith.truncf %102 : vector<8x8xf32> to vector<8x8xbf16>
    %104 = vector.extract_strided_slice %11 {offsets = [8, 0], sizes = [8, 8], strides = [1, 1]} : vector<16x32xf32> to vector<8x8xf32>
    %105 = arith.truncf %104 : vector<8x8xf32> to vector<8x8xbf16>
    %cst_26 = arith.constant dense<0.000000e+00> : vector<8x8xf32>
    %106 = tpu.matmul %101, %103, %cst_26 {dimension_numbers = #tpu.dot_dimension_numbers<[1], [1], [0], [0], [0, 0, 1, 0], [], []>} : vector<8x8xbf16>, vector<8x8xbf16>, vector<8x8xf32> -> vector<8x8xf32>
    %cst_27 = arith.constant -1.000000e+30 : f32
    %107 = vector.broadcast %cst_27 : f32 to vector<8x8xf32>
    %108 = arith.select %14, %107, %106 : vector<8x8xi1>, vector<8x8xf32>
    %cst_28 = arith.constant dense<0xFF800000> : vector<8xf32>
    %109 = vector.multi_reduction <maximumf>, %108, %cst_28 [1] : vector<8x8xf32> to vector<8xf32>
    %110 = vector.shape_cast %109 : vector<8xf32> to vector<8x1xf32>
    %111 = vector.broadcast %110 : vector<8x1xf32> to vector<8x8xf32>
    %112 = arith.subf %108, %111 : vector<8x8xf32>
    %113 = math.exp %112 : vector<8x8xf32>
    %cst_29 = arith.constant dense<0.000000e+00> : vector<8xf32>
    %114 = vector.multi_reduction <add>, %113, %cst_29 [1] : vector<8x8xf32> to vector<8xf32>
    %115 = vector.shape_cast %114 : vector<8xf32> to vector<8x1xf32>
    %116 = tpu.reciprocal %115 {approx = true} : vector<8x1xf32> -> vector<8x1xf32>
    %117 = vector.broadcast %116 : vector<8x1xf32> to vector<8x8xf32>
    %118 = arith.mulf %113, %117 : vector<8x8xf32>
    %119 = arith.truncf %118 : vector<8x8xf32> to vector<8x8xbf16>
    %cst_30 = arith.constant dense<0.000000e+00> : vector<8x8xf32>
    %120 = tpu.matmul %119, %105, %cst_30 {dimension_numbers = #tpu.dot_dimension_numbers<[1], [0], [0], [1], [0, 0, 1, 1], [], []>} : vector<8x8xbf16>, vector<8x8xbf16>, vector<8x8xf32> -> vector<8x8xf32>
    %121 = vector.extract_strided_slice %9 {offsets = [8, 8], sizes = [8, 8], strides = [1, 1]} : vector<16x32xf32> to vector<8x8xf32>
    %122 = arith.truncf %121 : vector<8x8xf32> to vector<8x8xbf16>
    %123 = vector.extract_strided_slice %10 {offsets = [8, 8], sizes = [8, 8], strides = [1, 1]} : vector<16x32xf32> to vector<8x8xf32>
    %124 = arith.truncf %123 : vector<8x8xf32> to vector<8x8xbf16>
    %125 = vector.extract_strided_slice %11 {offsets = [8, 8], sizes = [8, 8], strides = [1, 1]} : vector<16x32xf32> to vector<8x8xf32>
    %126 = arith.truncf %125 : vector<8x8xf32> to vector<8x8xbf16>
    %cst_31 = arith.constant dense<0.000000e+00> : vector<8x8xf32>
    %127 = tpu.matmul %122, %124, %cst_31 {dimension_numbers = #tpu.dot_dimension_numbers<[1], [1], [0], [0], [0, 0, 1, 0], [], []>} : vector<8x8xbf16>, vector<8x8xbf16>, vector<8x8xf32> -> vector<8x8xf32>
    %cst_32 = arith.constant -1.000000e+30 : f32
    %128 = vector.broadcast %cst_32 : f32 to vector<8x8xf32>
    %129 = arith.select %14, %128, %127 : vector<8x8xi1>, vector<8x8xf32>
    %cst_33 = arith.constant dense<0xFF800000> : vector<8xf32>
    %130 = vector.multi_reduction <maximumf>, %129, %cst_33 [1] : vector<8x8xf32> to vector<8xf32>
    %131 = vector.shape_cast %130 : vector<8xf32> to vector<8x1xf32>
    %132 = vector.broadcast %131 : vector<8x1xf32> to vector<8x8xf32>
    %133 = arith.subf %129, %132 : vector<8x8xf32>
    %134 = math.exp %133 : vector<8x8xf32>
    %cst_34 = arith.constant dense<0.000000e+00> : vector<8xf32>
    %135 = vector.multi_reduction <add>, %134, %cst_34 [1] : vector<8x8xf32> to vector<8xf32>
    %136 = vector.shape_cast %135 : vector<8xf32> to vector<8x1xf32>
    %137 = tpu.reciprocal %136 {approx = true} : vector<8x1xf32> -> vector<8x1xf32>
    %138 = vector.broadcast %137 : vector<8x1xf32> to vector<8x8xf32>
    %139 = arith.mulf %134, %138 : vector<8x8xf32>
    %140 = arith.truncf %139 : vector<8x8xf32> to vector<8x8xbf16>
    %cst_35 = arith.constant dense<0.000000e+00> : vector<8x8xf32>
    %141 = tpu.matmul %140, %126, %cst_35 {dimension_numbers = #tpu.dot_dimension_numbers<[1], [0], [0], [1], [0, 0, 1, 1], [], []>} : vector<8x8xbf16>, vector<8x8xbf16>, vector<8x8xf32> -> vector<8x8xf32>
    %142 = vector.extract_strided_slice %9 {offsets = [8, 16], sizes = [8, 8], strides = [1, 1]} : vector<16x32xf32> to vector<8x8xf32>
    %143 = arith.truncf %142 : vector<8x8xf32> to vector<8x8xbf16>
    %144 = vector.extract_strided_slice %10 {offsets = [8, 16], sizes = [8, 8], strides = [1, 1]} : vector<16x32xf32> to vector<8x8xf32>
    %145 = arith.truncf %144 : vector<8x8xf32> to vector<8x8xbf16>
    %146 = vector.extract_strided_slice %11 {offsets = [8, 16], sizes = [8, 8], strides = [1, 1]} : vector<16x32xf32> to vector<8x8xf32>
    %147 = arith.truncf %146 : vector<8x8xf32> to vector<8x8xbf16>
    %cst_36 = arith.constant dense<0.000000e+00> : vector<8x8xf32>
    %148 = tpu.matmul %143, %145, %cst_36 {dimension_numbers = #tpu.dot_dimension_numbers<[1], [1], [0], [0], [0, 0, 1, 0], [], []>} : vector<8x8xbf16>, vector<8x8xbf16>, vector<8x8xf32> -> vector<8x8xf32>
    %cst_37 = arith.constant -1.000000e+30 : f32
    %149 = vector.broadcast %cst_37 : f32 to vector<8x8xf32>
    %150 = arith.select %14, %149, %148 : vector<8x8xi1>, vector<8x8xf32>
    %cst_38 = arith.constant dense<0xFF800000> : vector<8xf32>
    %151 = vector.multi_reduction <maximumf>, %150, %cst_38 [1] : vector<8x8xf32> to vector<8xf32>
    %152 = vector.shape_cast %151 : vector<8xf32> to vector<8x1xf32>
    %153 = vector.broadcast %152 : vector<8x1xf32> to vector<8x8xf32>
    %154 = arith.subf %150, %153 : vector<8x8xf32>
    %155 = math.exp %154 : vector<8x8xf32>
    %cst_39 = arith.constant dense<0.000000e+00> : vector<8xf32>
    %156 = vector.multi_reduction <add>, %155, %cst_39 [1] : vector<8x8xf32> to vector<8xf32>
    %157 = vector.shape_cast %156 : vector<8xf32> to vector<8x1xf32>
    %158 = tpu.reciprocal %157 {approx = true} : vector<8x1xf32> -> vector<8x1xf32>
    %159 = vector.broadcast %158 : vector<8x1xf32> to vector<8x8xf32>
    %160 = arith.mulf %155, %159 : vector<8x8xf32>
    %161 = arith.truncf %160 : vector<8x8xf32> to vector<8x8xbf16>
    %cst_40 = arith.constant dense<0.000000e+00> : vector<8x8xf32>
    %162 = tpu.matmul %161, %147, %cst_40 {dimension_numbers = #tpu.dot_dimension_numbers<[1], [0], [0], [1], [0, 0, 1, 1], [], []>} : vector<8x8xbf16>, vector<8x8xbf16>, vector<8x8xf32> -> vector<8x8xf32>
    %163 = vector.extract_strided_slice %9 {offsets = [8, 24], sizes = [8, 8], strides = [1, 1]} : vector<16x32xf32> to vector<8x8xf32>
    %164 = arith.truncf %163 : vector<8x8xf32> to vector<8x8xbf16>
    %165 = vector.extract_strided_slice %10 {offsets = [8, 24], sizes = [8, 8], strides = [1, 1]} : vector<16x32xf32> to vector<8x8xf32>
    %166 = arith.truncf %165 : vector<8x8xf32> to vector<8x8xbf16>
    %167 = vector.extract_strided_slice %11 {offsets = [8, 24], sizes = [8, 8], strides = [1, 1]} : vector<16x32xf32> to vector<8x8xf32>
    %168 = arith.truncf %167 : vector<8x8xf32> to vector<8x8xbf16>
    %cst_41 = arith.constant dense<0.000000e+00> : vector<8x8xf32>
    %169 = tpu.matmul %164, %166, %cst_41 {dimension_numbers = #tpu.dot_dimension_numbers<[1], [1], [0], [0], [0, 0, 1, 0], [], []>} : vector<8x8xbf16>, vector<8x8xbf16>, vector<8x8xf32> -> vector<8x8xf32>
    %cst_42 = arith.constant -1.000000e+30 : f32
    %170 = vector.broadcast %cst_42 : f32 to vector<8x8xf32>
    %171 = arith.select %14, %170, %169 : vector<8x8xi1>, vector<8x8xf32>
    %cst_43 = arith.constant dense<0xFF800000> : vector<8xf32>
    %172 = vector.multi_reduction <maximumf>, %171, %cst_43 [1] : vector<8x8xf32> to vector<8xf32>
    %173 = vector.shape_cast %172 : vector<8xf32> to vector<8x1xf32>
    %174 = vector.broadcast %173 : vector<8x1xf32> to vector<8x8xf32>
    %175 = arith.subf %171, %174 : vector<8x8xf32>
    %176 = math.exp %175 : vector<8x8xf32>
    %cst_44 = arith.constant dense<0.000000e+00> : vector<8xf32>
    %177 = vector.multi_reduction <add>, %176, %cst_44 [1] : vector<8x8xf32> to vector<8xf32>
    %178 = vector.shape_cast %177 : vector<8xf32> to vector<8x1xf32>
    %179 = tpu.reciprocal %178 {approx = true} : vector<8x1xf32> -> vector<8x1xf32>
    %180 = vector.broadcast %179 : vector<8x1xf32> to vector<8x8xf32>
    %181 = arith.mulf %176, %180 : vector<8x8xf32>
    %182 = arith.truncf %181 : vector<8x8xf32> to vector<8x8xbf16>
    %cst_45 = arith.constant dense<0.000000e+00> : vector<8x8xf32>
    %183 = tpu.matmul %182, %168, %cst_45 {dimension_numbers = #tpu.dot_dimension_numbers<[1], [0], [0], [1], [0, 0, 1, 1], [], []>} : vector<8x8xbf16>, vector<8x8xbf16>, vector<8x8xf32> -> vector<8x8xf32>
    %184 = tpu.concatenate %120, %141, %162, %183 in 1 : vector<8x8xf32>, vector<8x8xf32>, vector<8x8xf32>, vector<8x8xf32> -> vector<8x32xf32>
    %185 = tpu.concatenate %99, %184 in 0 : vector<8x32xf32>, vector<8x32xf32> -> vector<16x32xf32>
    %186 = arith.truncf %185 : vector<16x32xf32> to vector<16x32xbf16>
    %c0_46 = arith.constant 0 : index
    %c0_47 = arith.constant 0 : index
    %187 = vector.load %arg3[%c0_46, %c0_47] : memref<32x32xbf16, #tpu.memory_space<vmem>>, vector<32x32xbf16>
    %cst_48 = arith.constant dense<0.000000e+00> : vector<16x32xf32>
    %188 = tpu.matmul %186, %187, %cst_48 {dimension_numbers = #tpu.dot_dimension_numbers<[1], [0], [0], [1], [0, 0, 1, 1], [], []>} : vector<16x32xbf16>, vector<32x32xbf16>, vector<16x32xf32> -> vector<16x32xf32>
    %c0_49 = arith.constant 0 : index
    %c0_50 = arith.constant 0 : index
    %189 = vector.load %arg4[%c0_49, %c0_50] : memref<1x32xf32, #tpu.memory_space<vmem>>, vector<1x32xf32>
    %190 = vector.broadcast %189 : vector<1x32xf32> to vector<16x32xf32>
    %191 = arith.addf %188, %190 : vector<16x32xf32>
    %192 = arith.addf %0, %191 : vector<16x32xf32>
    %193 = arith.truncf %192 : vector<16x32xf32> to vector<16x32xbf16>
    %c0_51 = arith.constant 0 : index
    %c0_52 = arith.constant 0 : index
    %194 = vector.load %arg5[%c0_51, %c0_52] : memref<32x64xbf16, #tpu.memory_space<vmem>>, vector<32x64xbf16>
    %cst_53 = arith.constant dense<0.000000e+00> : vector<16x64xf32>
    %195 = tpu.matmul %193, %194, %cst_53 {dimension_numbers = #tpu.dot_dimension_numbers<[1], [0], [0], [1], [0, 0, 1, 1], [], []>} : vector<16x32xbf16>, vector<32x64xbf16>, vector<16x64xf32> -> vector<16x64xf32>
    %c0_54 = arith.constant 0 : index
    %c0_55 = arith.constant 0 : index
    %196 = vector.load %arg6[%c0_54, %c0_55] : memref<1x64xf32, #tpu.memory_space<vmem>>, vector<1x64xf32>
    %197 = vector.broadcast %196 : vector<1x64xf32> to vector<16x64xf32>
    %198 = arith.addf %195, %197 : vector<16x64xf32>
    %cst_56 = arith.constant 0.000000e+00 : f32
    %199 = vector.broadcast %cst_56 : f32 to vector<16x64xf32>
    %200 = arith.maximumf %198, %199 : vector<16x64xf32>
    %201 = arith.truncf %200 : vector<16x64xf32> to vector<16x64xbf16>
    %c0_57 = arith.constant 0 : index
    %c0_58 = arith.constant 0 : index
    %202 = vector.load %arg7[%c0_57, %c0_58] : memref<64x32xbf16, #tpu.memory_space<vmem>>, vector<64x32xbf16>
    %cst_59 = arith.constant dense<0.000000e+00> : vector<16x32xf32>
    %203 = tpu.matmul %201, %202, %cst_59 {dimension_numbers = #tpu.dot_dimension_numbers<[1], [0], [0], [1], [0, 0, 1, 1], [], []>} : vector<16x64xbf16>, vector<64x32xbf16>, vector<16x32xf32> -> vector<16x32xf32>
    %c0_60 = arith.constant 0 : index
    %c0_61 = arith.constant 0 : index
    %204 = vector.load %arg8[%c0_60, %c0_61] : memref<1x32xf32, #tpu.memory_space<vmem>>, vector<1x32xf32>
    %205 = vector.broadcast %204 : vector<1x32xf32> to vector<16x32xf32>
    %206 = arith.addf %203, %205 : vector<16x32xf32>
    %207 = arith.addf %192, %206 : vector<16x32xf32>
    %c0_62 = arith.constant 0 : index
    %c0_63 = arith.constant 0 : index
    %208 = vector.load %arg9[%c0_62, %c0_63] : memref<16x32xf32, #tpu.memory_space<vmem>>, vector<16x32xf32>
    tpu.vector_store %arg9[%c0_62, %c0_63], %207 {strides = array<i32>} : memref<16x32xf32, #tpu.memory_space<vmem>>, vector<16x32xf32>,
    return
  }
}

</mosaic_0001>

<bundles_post_ra>
// kernel: tpu_custom_call.1
= control target key start
LH: loop header
LB: loop body
LE: loop exit
PB: predicated region body
PF: predicated region fallthrough
CT: control target
= control target key end

     0   :  { %14 = vsyncpa [#allocation3], 0  ;;  %s1996_s0 = inlined_call_operand.vmem [shape: f32[16,32], index: 0, kind: input, shape index: {}]   ;;  %s1997_s1 = inlined_call_operand.vmem [shape: bf16[32,96], index: 1, kind: input, shape index: {}]   ;;  %s1998_s2 = inlined_call_operand.vmem [shape: f32[1,96], index: 2, kind: input, shape index: {}]   ;;  %s1999_s3 = inlined_call_operand.vmem [shape: bf16[32,32], index: 3, kind: input, shape index: {}]   ;;  %s2000_s4 = inlined_call_operand.vmem [shape: f32[1,32], index: 4, kind: input, shape index: {}]   ;;  %s2001_s5 = inlined_call_operand.hbm [shape: bf16[32,64], index: 5, kind: input, shape index: {}]   ;;  %s2002_s6 = inlined_call_operand.vmem [shape: f32[1,64], index: 6, kind: input, shape index: {}]   ;;  %s2003_s7 = inlined_call_operand.vmem [shape: bf16[64,32], index: 7, kind: input, shape index: {}]   ;;  %s2004_s8 = inlined_call_operand.vmem [shape: f32[1,32], index: 8, kind: input, shape index: {}]   ;;  %s2005_s9 = inlined_call_operand.hbm [shape: f32[16,32], index: 9, kind: output, shape index: {}]  }
   0x1   :  { %15 = vsyncpa [#allocation4], 0  ;;  %s1635_s30 = smov [#allocation2]   ;;  %s1587_s13 = scalar_lea.hbm %s2001_s5, 256 }
   0x2   :  { %s31_s10 = sshll.u32 %s1635_s30, 4  ;;  %p1588_p0 = scmp.ne.s32.totalorder %s2001_s5, %s1587_s13  ;;  %s32_s10 = int_to_ptr.vmem [resolvable:$true] %s31_s10 }
   0x3   :  { %p1591_p1 = scmp.lt.u32.totalorder %s1587_s13, %s2001_s5 }
   0x5   :  { %p1593_p2 = pnand %p1591_p1, %p1588_p0 }
   0x7   :  { %1596 = shalt.err (!%p1593_p2)
}
   0x8   :  { %s1597_s18 = scalar_lea.vmem %s32_s10, 256  ;;  %p1602_p4 = scmp.lt.s32.totalorder %s32_s10, %s32_s10 }
   0x9   :  { %p1598_p3 = scmp.ne.s32.totalorder %s32_s10, %s1597_s18  ;;  %p1603_p5 = scmp.lt.s32.totalorder %s1597_s18, %s1597_s18 }
   0xb   :  { %p1604_p6 = por %p1603_p5, %p1602_p4 }
   0xd   :  { %p1605_p7 = pnand %p1604_p6, %p1598_p3 }
   0xf   :  { %1608 = shalt.err (!%p1605_p7)
}
  0x10   :  { %s1636_s19 = smov 64   ;;  %s1637_s20 = smov 4  }
  0x11   :  { %37 = dma.hbm_to_vmem [thread:$0]  %s2001_s5, 256, %s32_s10, [#allocation3], %s1636_s19, %s1636_s19, %s1637_s20  }
  0x12   :  { %1631 = dma.done.wait [#allocation3], 256  }
  0x13   :  { %1632 = vsyncadd [#allocation3], 4294967040  ;;  %v1638_v0 = vmov 0.0   ;;  %vm1639_vm0 = vmmov 0   ;;  %v1545_v1 = vld [vmem:[%s1997_s1] sm:$0xff]   ;;  %v1546_v2 = vld [vmem:[%s1997_s1 + $0x8] sm:$0xff]   ;;  %v121_v41 = vlaneseq }
  0x14   :  { %1378 = vmatprep.subr.bf16.mxu0 %v1638_v0  ;;  %1382 = vmatprep.mubr.msk.bf16.mxu0 %vm1639_vm0, %v1638_v0  ;;  %v1734_v3 = vld [vmem:[%s1996_s0] sm:$0xff]  ;;  %v1739_v4 = vld [vmem:[%s1996_s0 + $0x8] sm:$0xff]  ;;  %vm74_vm1 = vcmask 261120   ;;  %s1640_s0 = smov 96   ;;  %s1641_s10 = smov 120   ;;  %vm131_vm2 = vcmask 64512  }
  0x15   :  { %1386 = vmatprep.subr.bf16.mxu1 %v1638_v0  ;;  %1388 = vmatprep.mubr.msk.bf16.mxu1 %vm1639_vm0, %v1638_v0  ;;  %v50_v5 = vpack.c.bf16 %v1739_v4, %v1734_v3  ;;  %v1298_v6 = vld [vmem:[%s1998_s2] ss:$0 sm:$0xff]  ;;  %s1642_s11 = smov 88   ;;  %s1643_s12 = smov 80   ;;  %v122_v42 = vshrl.u32 %v121_v41, 7  ;;  %v124_v43 = vand.u32 127, %v121_v41 }
  0x16   :  { %1379 = vmatpush3.bf16.msra.mxu0 %v1545_v1  ;;  %s1644_s2 = smov 112   ;;  %s1645_s13 = smov 72   ;;  %vm196_vm4 = vcmask 1043456   ;;  %vm587_vm5 = vcmask 130048   ;;  %vm589_vm6 = vcmask 195584   ;;  %vm1232_vm7 = vcmask 523264  }
  0x17   :  { %1380 = vmatprep.subr.bf16.mxu0 %v1638_v0  ;;  %s1646_s14 = smov 104   ;;  %vm1803_vm3 = vcmp.gt.s32.totalorder %v124_v43, %v122_v42  ;;  %s1647_s15 = smov 56  }
  0x18   :  { %s1648_s16 = smov 48   ;;  %s1649_s17 = smov 40  }
  0x19   :  { %s1650_s20 = smov 8   ;;  %s1651_s23 = smov 16  }
  0x1a   :  { %1381 = vmatpush3.bf16.msra.mxu0 %v1546_v2  ;;  %s1652_s24 = smov 24  }
  0x1b   :  { %1392 = vmatprep.subr.bf16.mxu0 %v1638_v0 }
  0x1d   :  { %1383 = vmatmul.mubr.msk.bf16.vlgmr.msra.gmra.mrb[0].mxu0 %vm74_vm1, %v50_v5 }
  0x1e   :  { %1394 = vmatprep.mubr.msk.bf16.mxu0 %vm1639_vm0, %v1638_v0 }
  0xf0   :  { %v112_v7 = vpop.f32.mrb[0].mxu0 }
  0xf1   :  { %v113_v8 = vadd.f32 %v1298_v6, %v112_v7  ;;  %v1384_v9 = vpop.f32.mrb[1].mxu0 }
  0xf2   :  { %v115_v10 = vpop.f32.mrb[2].mxu0 }
  0xf3   :  { %v119_v11 = vmul.f32 0.35355338, %v113_v8  ;;  %v1751_v12 = vpack.c.bf16 %v113_v8, %v113_v8  ;;  %v1385_v13 = vpop.f32.mrb[3].mxu0  ;;  %v116_v15 = vadd.f32 %v1298_v6, %v115_v10 }
  0xf5   :  { %v126_v14 = vpack.c.bf16 %v119_v11, %v119_v11  ;;  %129 = vrot.lane.b32.xlu0 %v1751_v12, %s1640_s0  ;;  %v120_v16 = vmul.f32 0.35355338, %v116_v15  ;;  %v1757_v17 = vpack.c.bf16 %v116_v15, %v116_v15 }
  0xf7   :  { %241 = vrot.lane.b32.xlu1 %v126_v14, %s1641_s10  ;;  %v591_v18 = vpack.c.bf16 %v120_v16, %v120_v16 }
  0xf9   :  { %243 = vrot.lane.b32.xlu0 %v1751_v12, %s1642_s11 }
  0xfb   :  { %354 = vrot.lane.b32.xlu1 %v1751_v12, %s1643_s12 }
  0xfd   :  { %352 = vrot.lane.b32.xlu0 %v126_v14, %s1644_s2 }
  0xff   :  { %465 = vrot.lane.b32.xlu1 %v1751_v12, %s1645_s13 }
 0x101   :  { %463 = vrot.lane.b32.xlu0 %v126_v14, %s1646_s14 }
 0x103   :  { %594 = vrot.lane.b32.xlu1 %v1757_v17, %s1640_s0 }
 0x105   :  { %706 = vrot.lane.b32.xlu0 %v1757_v17, %s1642_s11 }
 0x107   :  { %704 = vrot.lane.b32.xlu1 %v591_v18, %s1641_s10 }
 0x109   :  { %817 = vrot.lane.b32.xlu0 %v1757_v17, %s1643_s12 }
 0x10b   :  { %815 = vrot.lane.b32.xlu1 %v591_v18, %s1644_s2 }
 0x10d   :  { %928 = vrot.lane.b32.xlu0 %v1757_v17, %s1645_s13 }
 0x10f   :  { %926 = vrot.lane.b32.xlu1 %v591_v18, %s1646_s14 }
 0x167   :  { %v130_v19 = vpop.permute.xlu0 %129 }
 0x168   :  { %v136_v20 = vsel %vm131_vm2, %v130_v19, 0 }
 0x169   :  { %1387 = vmatpush3.bf16.xpose.msra.mxu1 %v136_v20  ;;  %v242_v22 = vpop.permute.xlu1 %241 }
 0x16a   :  { %1398 = vmatprep.subr.bf16.mxu1 %v1638_v0 }
 0x16b   :  { %v244_v21 = vpop.permute.xlu0 %243 }
 0x16c   :  { %v249_v23 = vsel %vm131_vm2, %v244_v21, 0 }
 0x16d   :  { %v355_v24 = vpop.permute.xlu1 %354 }
 0x16e   :  { %v360_v25 = vsel %vm131_vm2, %v355_v24, 0 }
 0x16f   :  { %v353_v27 = vpop.permute.xlu0 %352 }
 0x170   :  { %1389 = vmatmul.mubr.msk.bf16.vlgmr.msra.gmra.mrb[0].mxu1 %vm131_vm2, %v126_v14 }
 0x171   :  { %1399 = vmatpush3.bf16.xpose.msra.mxu1 %v249_v23  ;;  %1400 = vmatprep.mubr.msk.bf16.mxu1 %vm1639_vm0, %v1638_v0  ;;  %v466_v26 = vpop.permute.xlu1 %465 }
 0x172   :  { %1410 = vmatprep.subr.bf16.mxu1 %v1638_v0  ;;  %v471_v28 = vsel %vm131_vm2, %v466_v26, 0 }
 0x173   :  { %v464_v30 = vpop.permute.xlu0 %463 }
 0x175   :  { %v595_v29 = vpop.permute.xlu1 %594 }
 0x176   :  { %v600_v31 = vsel %vm131_vm2, %v595_v29, 0 }
 0x177   :  { %v707_v32 = vpop.permute.xlu0 %706 }
 0x178   :  { %1401 = vmatmul.mubr.msk.bf16.vlgmr.msra.gmra.mrb[4].mxu1 %vm131_vm2, %v242_v22  ;;  %v712_v33 = vsel %vm131_vm2, %v707_v32, 0 }
 0x179   :  { %1411 = vmatpush3.bf16.xpose.msra.mxu1 %v360_v25  ;;  %1412 = vmatprep.mubr.msk.bf16.mxu1 %vm1639_vm0, %v1638_v0  ;;  %v705_v35 = vpop.permute.xlu1 %704 }
 0x17a   :  { %1422 = vmatprep.subr.bf16.mxu1 %v1638_v0 }
 0x17b   :  { %v818_v34 = vpop.permute.xlu0 %817 }
 0x17c   :  { %v823_v36 = vsel %vm131_vm2, %v818_v34, 0 }
 0x17d   :  { %v816_v38 = vpop.permute.xlu1 %815 }
 0x17f   :  { %v929_v37 = vpop.permute.xlu0 %928 }
 0x180   :  { %1413 = vmatmul.mubr.msk.bf16.vlgmr.msra.gmra.mrb[8].mxu1 %vm131_vm2, %v353_v27  ;;  %v934_v39 = vsel %vm131_vm2, %v929_v37, 0 }
 0x181   :  { %1423 = vmatpush3.bf16.xpose.msra.mxu1 %v471_v28  ;;  %1424 = vmatprep.mubr.msk.bf16.mxu1 %vm1639_vm0, %v1638_v0  ;;  %v927_v40 = vpop.permute.xlu1 %926 }
 0x182   :  { %1434 = vmatprep.subr.bf16.mxu1 %v1638_v0 }
 0x188   :  { %1425 = vmatmul.mubr.msk.bf16.vlgmr.msra.gmra.mrb[12].mxu1 %vm131_vm2, %v464_v30 }
 0x189   :  { %1435 = vmatpush3.bf16.xpose.msra.mxu1 %v600_v31  ;;  %1436 = vmatprep.mubr.msk.bf16.mxu1 %vm1639_vm0, %v1638_v0 }
 0x18a   :  { %1446 = vmatprep.subr.bf16.mxu1 %v1638_v0 }
 0x190   :  { %1437 = vmatmul.mubr.msk.bf16.vlgmr.msra.gmra.mrb[16].mxu1 %vm131_vm2, %v591_v18 }
 0x191   :  { %1447 = vmatpush3.bf16.xpose.msra.mxu1 %v712_v33  ;;  %1448 = vmatprep.mubr.msk.bf16.mxu1 %vm1639_vm0, %v1638_v0 }
 0x192   :  { %1458 = vmatprep.subr.bf16.mxu1 %v1638_v0 }
 0x198   :  { %1449 = vmatmul.mubr.msk.bf16.vlgmr.msra.gmra.mrb[20].mxu1 %vm131_vm2, %v705_v35 }
 0x199   :  { %1459 = vmatpush3.bf16.xpose.msra.mxu1 %v823_v36  ;;  %1460 = vmatprep.mubr.msk.bf16.mxu1 %vm1639_vm0, %v1638_v0 }
 0x19a   :  { %1470 = vmatprep.subr.bf16.mxu1 %v1638_v0 }
 0x1a0   :  { %1461 = vmatmul.mubr.msk.bf16.vlgmr.msra.gmra.mrb[24].mxu1 %vm131_vm2, %v816_v38 }
 0x1a1   :  { %1471 = vmatpush3.bf16.xpose.msra.mxu1 %v934_v39  ;;  %1472 = vmatprep.mubr.msk.bf16.mxu1 %vm1639_vm0, %v1638_v0 }
 0x1a2   :  { %1482 = vmatprep.subr.bf16.mxu1 %v1638_v0 }
 0x1a8   :  { %1473 = vmatmul.mubr.msk.bf16.vlgmr.msra.gmra.mrb[28].mxu1 %vm131_vm2, %v927_v40 }
 0x1a9   :  { %1486 = vmatprep.mubr.msk.bf16.mxu1 %vm1639_vm0, %v1638_v0 }
 0x243   :  { %v172_v45 = vpop.f32.mrb[0].mxu1 }
 0x244   :  { %v178_v46 = vsel %vm1803_vm3, -1e+30, %v172_v45  ;;  %v1390_v47 = vpop.f32.mrb[1].mxu1 }
 0x245   :  { %v175_v48 = vpop.f32.mrb[2].mxu1  ;;  %v179_v49 = vsel %vm131_vm2, %v178_v46, -inf }
 0x246   :  { %v1391_v50 = vpop.f32.mrb[3].mxu1  ;;  %180 = vmax.xlane.f32.xlu0 %v179_v49 }
 0x24b   :  { %v285_v51 = vpop.f32.mrb[4].mxu1 }
 0x24c   :  { %v291_v52 = vsel %vm1803_vm3, -1e+30, %v285_v51  ;;  %v1402_v53 = vpop.f32.mrb[5].mxu1 }
 0x24d   :  { %v288_v54 = vpop.f32.mrb[6].mxu1  ;;  %v292_v55 = vsel %vm131_vm2, %v291_v52, -inf }
 0x24e   :  { %v1403_v56 = vpop.f32.mrb[7].mxu1  ;;  %293 = vmax.xlane.f32.xlu1 %v292_v55 }
 0x253   :  { %v396_v57 = vpop.f32.mrb[8].mxu1 }
 0x254   :  { %v402_v58 = vsel %vm1803_vm3, -1e+30, %v396_v57  ;;  %v1414_v59 = vpop.f32.mrb[9].mxu1 }
 0x255   :  { %v399_v60 = vpop.f32.mrb[10].mxu1  ;;  %v403_v61 = vsel %vm131_vm2, %v402_v58, -inf }
 0x256   :  { %v1415_v62 = vpop.f32.mrb[11].mxu1  ;;  %404 = vmax.xlane.f32.xlu0 %v403_v61 }
 0x25b   :  { %v507_v63 = vpop.f32.mrb[12].mxu1 }
 0x25c   :  { %v1818_v1 = vsel %vm1803_vm3, -1e+30, %v507_v63  ;;  %v1426_v2 = vpop.f32.mrb[13].mxu1 }
 0x25d   :  { %v510_v5 = vpop.f32.mrb[14].mxu1  ;;  %v514_v6 = vsel %vm131_vm2, %v1818_v1, -inf }
 0x25e   :  { %v1427_v7 = vpop.f32.mrb[15].mxu1  ;;  %515 = vmax.xlane.f32.xlu0 %v514_v6 }
 0x263   :  { %v636_v8 = vpop.f32.mrb[16].mxu1 }
 0x264   :  { %v1824_v9 = vsel %vm1803_vm3, -1e+30, %v636_v8  ;;  %v1438_v10 = vpop.f32.mrb[17].mxu1 }
 0x265   :  { %v639_v11 = vpop.f32.mrb[18].mxu1  ;;  %v643_v13 = vsel %vm131_vm2, %v1824_v9, -inf }
 0x266   :  { %644 = vmax.xlane.f32.xlu1 %v643_v13  ;;  %v1439_v14 = vpop.f32.mrb[19].mxu1 }
 0x26b   :  { %v748_v15 = vpop.f32.mrb[20].mxu1 }
 0x26c   :  { %v1830_v16 = vsel %vm1803_vm3, -1e+30, %v748_v15  ;;  %v1450_v18 = vpop.f32.mrb[21].mxu1 }
 0x26d   :  { %v751_v19 = vpop.f32.mrb[22].mxu1  ;;  %v755_v20 = vsel %vm131_vm2, %v1830_v16, -inf }
 0x26e   :  { %756 = vmax.xlane.f32.xlu0 %v755_v20  ;;  %v1451_v21 = vpop.f32.mrb[23].mxu1 }
 0x273   :  { %v859_v22 = vpop.f32.mrb[24].mxu1 }
 0x274   :  { %v865_v23 = vsel %vm1803_vm3, -1e+30, %v859_v22  ;;  %v1462_v24 = vpop.f32.mrb[25].mxu1 }
 0x275   :  { %v862_v25 = vpop.f32.mrb[26].mxu1  ;;  %v866_v26 = vsel %vm131_vm2, %v865_v23, -inf }
 0x276   :  { %867 = vmax.xlane.f32.xlu1 %v866_v26  ;;  %v1463_v27 = vpop.f32.mrb[27].mxu1 }
 0x27b   :  { %v970_v28 = vpop.f32.mrb[28].mxu1 }
 0x27c   :  { %v1839_v29 = vsel %vm1803_vm3, -1e+30, %v970_v28  ;;  %v1474_v30 = vpop.f32.mrb[29].mxu1 }
 0x27d   :  { %v973_v31 = vpop.f32.mrb[30].mxu1  ;;  %v977_v33 = vsel %vm131_vm2, %v1839_v29, -inf }
 0x27e   :  { %v1475_v32 = vpop.f32.mrb[31].mxu1 }
 0x284   :  { %304 = vrot.lane.b32.xlu0 %v1751_v12, %s1647_s15 }
 0x287   :  { %191 = vrot.lane.b32.xlu1 %v1751_v12, %s1636_s19 }
 0x2a3   :  { %978 = vmax.xlane.f32.xlu0 %v977_v33 }
 0x2d3   :  { %v181_v34 = vpop.xlane.xlu0 %180 }
 0x2d4   :  { %v182_v35 = vsub.f32 %v178_v46, %v181_v34 }
 0x2d6   :  { %v183_v36 = vmul.f32 1.442695, %v182_v35 }
 0x2d8   :  { %1555 = vpow2.f32 %v183_v36 }
 0x2db   :  { %v294_v37 = vpop.xlane.xlu1 %293 }
 0x2dc   :  { %v295_v38 = vsub.f32 %v291_v52, %v294_v37 }
 0x2de   :  { %v296_v39 = vmul.f32 1.442695, %v295_v38 }
 0x2e0   :  { %1557 = vpow2.f32 %v296_v39 }
 0x2e2   :  { %v1847_v40 = vpop.eup %1555 }
 0x2e3   :  { %v405_v41 = vpop.xlane.xlu0 %404  ;;  %v185_v42 = vsel %vm131_vm2, %v1847_v40, 0.0 }
 0x2e4   :  { %v406_v43 = vsub.f32 %v402_v58, %v405_v41  ;;  %186 = vadd.xlane.f32.xlu1 %v185_v42 }
 0x2e6   :  { %v407_v44 = vmul.f32 1.442695, %v406_v43 }
 0x2e8   :  { %1559 = vpow2.f32 %v407_v44 }
 0x2ea   :  { %v1851_v45 = vpop.eup %1557 }
 0x2eb   :  { %v298_v46 = vsel %vm131_vm2, %v1851_v45, 0.0  ;;  %v516_v52 = vpop.xlane.xlu0 %515 }
 0x2ec   :  { %299 = vadd.xlane.f32.xlu0 %v298_v46  ;;  %v517_v54 = vsub.f32 %v1818_v1, %v516_v52 }
 0x2ee   :  { %v518_v55 = vmul.f32 1.442695, %v517_v54 }
 0x2f0   :  { %1561 = vpow2.f32 %v518_v55 }
 0x2f2   :  { %v1855_v47 = vpop.eup %1559 }
 0x2f3   :  { %v409_v48 = vsel %vm131_vm2, %v1855_v47, 0.0  ;;  %v645_v49 = vpop.xlane.xlu1 %644 }
 0x2f4   :  { %410 = vadd.xlane.f32.xlu1 %v409_v48  ;;  %v646_v56 = vsub.f32 %v1824_v9, %v645_v49 }
 0x2f6   :  { %v647_v59 = vmul.f32 1.442695, %v646_v56 }
 0x2f8   :  { %1563 = vpow2.f32 %v647_v59 }
 0x2fa   :  { %v1562_v62 = vpop.eup %1561 }
 0x2fb   :  { %v757_v57 = vpop.xlane.xlu0 %756  ;;  %v520_v63 = vsel %vm131_vm2, %v1562_v62, 0.0 }
 0x2fc   :  { %v758_v58 = vsub.f32 %v1830_v16, %v757_v57 }
 0x2ff   :  { %v305_v9 = vpop.permute.xlu0 %304 }
 0x300   :  { %v310_v22 = vsel %vm196_vm4, %v305_v9, 0 }
 0x302   :  { %415 = vrot.lane.b32.xlu0 %v1751_v12, %s1648_s16  ;;  %v1869_v2 = vpop.eup %1563 }
 0x303   :  { %v868_v50 = vpop.xlane.xlu1 %867  ;;  %v649_v5 = vsel %vm131_vm2, %v1869_v2, 0.0 }
 0x304   :  { %v869_v60 = vsub.f32 %v865_v23, %v868_v50 }
 0x305   :  { %526 = vrot.lane.b32.xlu1 %v1751_v12, %s1649_s17  ;;  %v759_v12 = vmul.f32 1.442695, %v758_v58 }
 0x306   :  { %v870_v61 = vmul.f32 1.442695, %v869_v60 }
 0x307   :  { %v192_v51 = vpop.permute.xlu1 %191  ;;  %1565 = vpow2.f32 %v759_v12 }
 0x308   :  { %v198_v53 = vsel %vm196_vm4, %v192_v51, 0  ;;  %1567 = vpow2.f32 %v870_v61 }
 0x309   :  { %1393 = vmatpush3.bf16.msra.mxu0 %v198_v53 }
 0x30a   :  { %1404 = vmatprep.subr.bf16.mxu0 %v1638_v0 }
 0x311   :  { %v1871_v1 = vpop.eup %1565 }
 0x312   :  { %v1875_v6 = vpop.eup %1567  ;;  %v761_v7 = vsel %vm131_vm2, %v1871_v1, 0.0 }
 0x313   :  { %v872_v8 = vsel %vm131_vm2, %v1875_v6, 0.0 }
 0x321   :  { %521 = vadd.xlane.f32.xlu0 %v520_v63 }
 0x325   :  { %650 = vadd.xlane.f32.xlu0 %v649_v5 }
 0x329   :  { %762 = vadd.xlane.f32.xlu1 %v761_v7  ;;  %873 = vadd.xlane.f32.xlu0 %v872_v8 }
 0x330   :  { %v979_v10 = vpop.xlane.xlu0 %978 }
 0x331   :  { %v980_v11 = vsub.f32 %v1839_v29, %v979_v10 }
 0x333   :  { %v981_v13 = vmul.f32 1.442695, %v980_v11 }
 0x335   :  { %1569 = vpow2.f32 %v981_v13 }
 0x33a   :  { %767 = vrot.lane.b32.xlu1 %v1757_v17, %s1647_s15 }
 0x33e   :  { %878 = vrot.lane.b32.xlu1 %v1757_v17, %s1648_s16 }
 0x33f   :  { %v1886_v14 = vpop.eup %1569 }
 0x340   :  { %v983_v15 = vsel %vm131_vm2, %v1886_v14, 0.0 }
 0x341   :  { %984 = vadd.xlane.f32.xlu0 %v983_v15 }
 0x342   :  { %989 = vrot.lane.b32.xlu1 %v1757_v17, %s1649_s17 }
 0x357   :  { %655 = vrot.lane.b32.xlu0 %v1757_v17, %s1636_s19 }
 0x371   :  { %v187_v16 = vpop.xlane.xlu1 %186 }
 0x372   :  { %1571 = vrcp.f32 %v187_v16 }
 0x379   :  { %v300_v18 = vpop.xlane.xlu0 %299 }
 0x37a   :  { %1573 = vrcp.f32 %v300_v18 }
 0x37c   :  { %v1572_v19 = vpop.eup %1571 }
 0x37d   :  { %v189_v20 = vmul.f32 %v1572_v19, %v1847_v40  ;;  %v416_v25 = vpop.permute.xlu0 %415 }
 0x37e   :  { %v421_v27 = vsel %vm196_vm4, %v416_v25, 0 }
 0x37f   :  { %v190_v21 = vpack.c.bf16 %v189_v20, %v189_v20 }
 0x381   :  { %1395 = vmatmul.mubr.msk.bf16.vlgmr.msra.gmra.mrb[4].mxu0 %vm131_vm2, %v190_v21  ;;  %v411_v23 = vpop.xlane.xlu1 %410 }
 0x382   :  { %1405 = vmatpush3.bf16.msra.mxu0 %v310_v22  ;;  %1575 = vrcp.f32 %v411_v23  ;;  %1406 = vmatprep.mubr.msk.bf16.mxu0 %vm1639_vm0, %v1638_v0  ;;  %v1547_v22 = vld [vmem:[%s1999_s3] sm:$0xff]  }
 0x383   :  { %1416 = vmatprep.subr.bf16.mxu0 %v1638_v0  ;;  %1483 = vmatpush3.bf16.msra.mxu1 %v1547_v22 }
 0x384   :  { %v1574_v17 = vpop.eup %1573  ;;  %1484 = vmatprep.subr.bf16.mxu1 %v1638_v0 }
 0x385   :  { %v302_v24 = vmul.f32 %v1574_v17, %v1851_v45  ;;  %v527_v30 = vpop.permute.xlu1 %526 }
 0x386   :  { %v532_v32 = vsel %vm196_vm4, %v527_v30, 0 }
 0x387   :  { %v303_v26 = vpack.c.bf16 %v302_v24, %v302_v24 }
 0x389   :  { %1407 = vmatmul.mubr.msk.bf16.vlgmr.msra.gmra.mrb[8].mxu0 %vm131_vm2, %v303_v26  ;;  %v1548_v26 = vld [vmem:[%s1999_s3 + $0x8] sm:$0xff]  }
 0x38a   :  { %1417 = vmatpush3.bf16.msra.mxu0 %v421_v27  ;;  %1418 = vmatprep.mubr.msk.bf16.mxu0 %vm1639_vm0, %v1638_v0 }
 0x38b   :  { %1428 = vmatprep.subr.bf16.mxu0 %v1638_v0  ;;  %1485 = vmatpush3.bf16.msra.mxu1 %v1548_v26 }
 0x38c   :  { %v1576_v28 = vpop.eup %1575  ;;  %1498 = vmatprep.subr.bf16.mxu1 %v1638_v0 }
 0x38d   :  { %v413_v29 = vmul.f32 %v1576_v28, %v1855_v47 }
 0x38f   :  { %v414_v31 = vpack.c.bf16 %v413_v29, %v413_v29 }
 0x391   :  { %1419 = vmatmul.mubr.msk.bf16.vlgmr.msra.gmra.mrb[12].mxu0 %vm131_vm2, %v414_v31 }
 0x392   :  { %1429 = vmatpush3.bf16.msra.mxu0 %v532_v32  ;;  %1430 = vmatprep.mubr.msk.bf16.mxu0 %vm1639_vm0, %v1638_v0 }
 0x393   :  { %1440 = vmatprep.subr.bf16.mxu0 %v1638_v0 }
 0x3ae   :  { %v522_v33 = vpop.xlane.xlu0 %521 }
 0x3af   :  { %1577 = vrcp.f32 %v522_v33 }
 0x3b2   :  { %v651_v37 = vpop.xlane.xlu0 %650 }
 0x3b3   :  { %1579 = vrcp.f32 %v651_v37 }
 0x3b6   :  { %v763_v38 = vpop.xlane.xlu1 %762  ;;  %v874_v39 = vpop.xlane.xlu0 %873 }
 0x3b7   :  { %1581 = vrcp.f32 %v763_v38 }
 0x3b8   :  { %1583 = vrcp.f32 %v874_v39 }
 0x3b9   :  { %v1578_v34 = vpop.eup %1577 }
 0x3ba   :  { %v524_v35 = vmul.f32 %v1578_v34, %v1562_v62  ;;  %v768_v45 = vpop.permute.xlu1 %767 }
 0x3bb   :  { %v773_v48 = vsel %vm196_vm4, %v768_v45, 0 }
 0x3bc   :  { %v525_v36 = vpack.c.bf16 %v524_v35, %v524_v35 }
 0x3bd   :  { %v1580_v40 = vpop.eup %1579 }
 0x3be   :  { %1431 = vmatmul.mubr.msk.bf16.vlgmr.msra.gmra.mrb[16].mxu0 %vm131_vm2, %v525_v36  ;;  %v653_v42 = vmul.f32 %v1580_v40, %v1869_v2  ;;  %v879_v50 = vpop.permute.xlu1 %878 }
 0x3bf   :  { %1442 = vmatprep.mubr.msk.bf16.mxu0 %vm1639_vm0, %v1638_v0  ;;  %v884_v53 = vsel %vm196_vm4, %v879_v50, 0 }
 0x3c0   :  { %v654_v46 = vpack.c.bf16 %v653_v42, %v653_v42 }
 0x3c1   :  { %v1582_v47 = vpop.eup %1581 }
 0x3c2   :  { %v765_v49 = vmul.f32 %v1582_v47, %v1871_v1  ;;  %v1584_v52 = vpop.eup %1583  ;;  %v990_v55 = vpop.permute.xlu1 %989 }
 0x3c3   :  { %v876_v54 = vmul.f32 %v1584_v52, %v1875_v6  ;;  %v995_v58 = vsel %vm196_vm4, %v990_v55, 0  ;;  %v1551_v55 = vld [vmem:[%s2003_s7] sm:$0xff]  }
 0x3c4   :  { %v766_v51 = vpack.c.bf16 %v765_v49, %v765_v49 }
 0x3c5   :  { %v877_v56 = vpack.c.bf16 %v876_v54, %v876_v54  ;;  %v1550_v54 = vld [vmem:[#allocation2 + $0x8] sm:$0xff]  }
 0x3ce   :  { %v985_v41 = vpop.xlane.xlu0 %984 }
 0x3cf   :  { %1585 = vrcp.f32 %v985_v41 }
 0x3d2   :  { %v656_v43 = vpop.permute.xlu0 %655 }
 0x3d3   :  { %v661_v44 = vsel %vm196_vm4, %v656_v43, 0 }
 0x3d4   :  { %1441 = vmatpush3.bf16.msra.mxu0 %v661_v44 }
 0x3d5   :  { %1452 = vmatprep.subr.bf16.mxu0 %v1638_v0 }
 0x3d7   :  { %1443 = vmatmul.mubr.msk.bf16.vlgmr.msra.gmra.mrb[20].mxu0 %vm131_vm2, %v654_v46 }
 0x3d8   :  { %1453 = vmatpush3.bf16.msra.mxu0 %v773_v48  ;;  %1454 = vmatprep.mubr.msk.bf16.mxu0 %vm1639_vm0, %v1638_v0 }
 0x3d9   :  { %1464 = vmatprep.subr.bf16.mxu0 %v1638_v0  ;;  %v1586_v57 = vpop.eup %1585 }
 0x3da   :  { %v987_v59 = vmul.f32 %v1586_v57, %v1886_v14  ;;  %v1318_v57 = vld [vmem:[%s2000_s4] ss:$0 sm:$0xff] }
 0x3dc   :  { %v988_v60 = vpack.c.bf16 %v987_v59, %v987_v59 }
 0x3df   :  { %1455 = vmatmul.mubr.msk.bf16.vlgmr.msra.gmra.mrb[24].mxu0 %vm131_vm2, %v766_v51 }
 0x3e0   :  { %1465 = vmatpush3.bf16.msra.mxu0 %v884_v53  ;;  %1466 = vmatprep.mubr.msk.bf16.mxu0 %vm1639_vm0, %v1638_v0  ;;  %v1549_v53 = vld [vmem:[#allocation2] sm:$0xff]  }
 0x3e1   :  { %1476 = vmatprep.subr.bf16.mxu0 %v1638_v0 }
 0x3e7   :  { %1467 = vmatmul.mubr.msk.bf16.vlgmr.msra.gmra.mrb[28].mxu0 %vm131_vm2, %v877_v56  ;;  %v1552_v56 = vld [vmem:[%s2003_s7 + $0x8] sm:$0xff]  }
 0x3e8   :  { %1477 = vmatpush3.bf16.msra.mxu0 %v995_v58  ;;  %1478 = vmatprep.mubr.msk.bf16.mxu0 %vm1639_vm0, %v1638_v0 }
 0x3e9   :  { %1490 = vmatprep.subr.bf16.mxu0 %v1638_v0 }
 0x3ef   :  { %1479 = vmatmul.mubr.msk.bf16.vlgmr.msra.gmra.mrb[32].mxu0 %vm131_vm2, %v988_v60 }
 0x3f0   :  { %1494 = vmatprep.mubr.msk.bf16.mxu0 %vm1639_vm0, %v1638_v0  ;;  %1491 = vmatpush3.bf16.msra.mxu0 %v1549_v53 }
 0x3f1   :  { %1492 = vmatprep.subr.bf16.mxu0 %v1638_v0 }
 0x3f4   :  { %1493 = vmatpush3.bf16.msra.mxu0 %v1550_v54 }
 0x454   :  { %v234_v12 = vpop.f32.mrb[4].mxu0 }
 0x455   :  { %v1396_v61 = vpop.f32.mrb[5].mxu0 }
 0x456   :  { %v237_v62 = vpop.f32.mrb[6].mxu0 }
 0x457   :  { %v1397_v63 = vpop.f32.mrb[7].mxu0 }
 0x45c   :  { %v346_v2 = vpop.f32.mrb[8].mxu0 }
 0x45d   :  { %v1408_v1 = vpop.f32.mrb[9].mxu0 }
 0x45e   :  { %v349_v5 = vpop.f32.mrb[10].mxu0 }
 0x45f   :  { %v1409_v6 = vpop.f32.mrb[11].mxu0  ;;  %v1553_v5 = vld [vmem:[%s2003_s7 + $0x10] sm:$0xff]  }
 0x460   :  { %v1554_v6 = vld [vmem:[%s2003_s7 + $0x18] sm:$0xff]  }
 0x464   :  { %v457_v7 = vpop.f32.mrb[12].mxu0 }
 0x465   :  { %v1420_v8 = vpop.f32.mrb[13].mxu0 }
 0x466   :  { %v460_v9 = vpop.f32.mrb[14].mxu0 }
 0x467   :  { %v1421_v10 = vpop.f32.mrb[15].mxu0 }
 0x491   :  { %v568_v11 = vpop.f32.mrb[16].mxu0 }
 0x492   :  { %v1432_v13 = vpop.f32.mrb[17].mxu0 }
 0x493   :  { %v571_v14 = vpop.f32.mrb[18].mxu0 }
 0x494   :  { %v1433_v15 = vpop.f32.mrb[19].mxu0 }
 0x4aa   :  { %v697_v16 = vpop.f32.mrb[20].mxu0 }
 0x4ab   :  { %v1444_v18 = vpop.f32.mrb[21].mxu0 }
 0x4ac   :  { %v700_v19 = vpop.f32.mrb[22].mxu0 }
 0x4ad   :  { %v1445_v20 = vpop.f32.mrb[23].mxu0 }
 0x4b2   :  { %v809_v21 = vpop.f32.mrb[24].mxu0 }
 0x4b3   :  { %v1530_v23 = vpack.i.bf16 %v809_v21, %v346_v2  ;;  %v1456_v17 = vpop.f32.mrb[25].mxu0 }
 0x4b4   :  { %v812_v24 = vpop.f32.mrb[26].mxu0 }
 0x4b5   :  { %1531 = vrot.lane.b32.xlu1 %v1530_v23, %s1650_s20  ;;  %v1457_v25 = vpop.f32.mrb[27].mxu0 }
 0x4ba   :  { %v920_v27 = vpop.f32.mrb[28].mxu0 }
 0x4bb   :  { %v1535_v28 = vpack.i.bf16 %v920_v27, %v457_v7  ;;  %v1468_v29 = vpop.f32.mrb[29].mxu0 }
 0x4bc   :  { %v923_v30 = vpop.f32.mrb[30].mxu0 }
 0x4bd   :  { %1536 = vrot.lane.b32.xlu1 %v1535_v28, %s1651_s23  ;;  %v1469_v31 = vpop.f32.mrb[31].mxu0 }
 0x4c2   :  { %v1031_v32 = vpop.f32.mrb[32].mxu0 }
 0x4c3   :  { %v1540_v33 = vpack.i.bf16 %v1031_v32, %v568_v11  ;;  %v1480_v34 = vpop.f32.mrb[33].mxu0 }
 0x4c4   :  { %v1034_v35 = vpop.f32.mrb[34].mxu0 }
 0x4c5   :  { %1541 = vrot.lane.b32.xlu0 %v1540_v33, %s1652_s24  ;;  %v1481_v36 = vpop.f32.mrb[35].mxu0 }
 0x527   :  { %v1532_v37 = vpop.permute.xlu1 %1531 }
 0x528   :  { %v1534_v39 = vunpack.i.h.bf16 %v1532_v37  ;;  %v1533_v40 = vunpack.i.l.bf16 %v1532_v37 }
 0x52a   :  { %v1049_v44 = vsel %vm131_vm2, %v697_v16, %v1534_v39  ;;  %v586_v45 = vsel %vm131_vm2, %v234_v12, %v1533_v40 }
 0x52f   :  { %v1537_v38 = vpop.permute.xlu1 %1536 }
 0x530   :  { %v1539_v41 = vunpack.i.h.bf16 %v1537_v38  ;;  %v1538_v42 = vunpack.i.l.bf16 %v1537_v38 }
 0x532   :  { %v1050_v48 = vsel %vm587_vm5, %v1049_v44, %v1539_v41  ;;  %v588_v49 = vsel %vm587_vm5, %v586_v45, %v1538_v42 }
 0x537   :  { %v1542_v43 = vpop.permute.xlu0 %1541 }
 0x538   :  { %v1544_v46 = vunpack.i.h.bf16 %v1542_v43  ;;  %v1543_v47 = vunpack.i.l.bf16 %v1542_v43 }
 0x53a   :  { %v1051_v50 = vsel %vm589_vm6, %v1050_v48, %v1544_v46  ;;  %v590_v51 = vsel %vm589_vm6, %v588_v49, %v1543_v47 }
 0x53b   :  { %v1052_v52 = vpack.c.bf16 %v1051_v50, %v590_v51 }
 0x53d   :  { %1487 = vmatmul.mubr.msk.bf16.vlgmr.msra.gmra.mrb[32].mxu1 %vm74_vm1, %v1052_v52 }
 0x53e   :  { %1506 = vmatprep.mubr.msk.bf16.mxu1 %vm1639_vm0, %v1638_v0  ;;  %1499 = vmatpush3.bf16.msra.mxu1 %v1551_v55 }
 0x53f   :  { %1500 = vmatprep.subr.bf16.mxu1 %v1638_v0 }
 0x542   :  { %1501 = vmatpush3.bf16.msra.mxu1 %v1552_v56 }
 0x543   :  { %1502 = vmatprep.subr.bf16.mxu1 %v1638_v0 }
 0x546   :  { %1503 = vmatpush3.bf16.msra.mxu1 %v1553_v5 }
 0x547   :  { %1504 = vmatprep.subr.bf16.mxu1 %v1638_v0  ;;  %v1326_v0 = vld [vmem:[%s2004_s8] ss:$0 sm:$0xff] }
 0x54a   :  { %1505 = vmatpush3.bf16.msra.mxu1 %v1554_v6 }
 0x610   :  { %v1113_v58 = vpop.f32.mrb[32].mxu1 }
 0x611   :  { %v1114_v59 = vadd.f32 %v1318_v57, %v1113_v58  ;;  %v1488_v60 = vpop.f32.mrb[33].mxu1 }
 0x612   :  { %v1116_v12 = vpop.f32.mrb[34].mxu1 }
 0x613   :  { %v1117_v61 = vadd.f32 %v1318_v57, %v1116_v12  ;;  %v1489_v62 = vpop.f32.mrb[35].mxu1  ;;  %v1120_v63 = vadd.f32 %v1114_v59, %v1734_v3  ;;  %v1322_v3 = vld [vmem:[%s2002_s6] ss:$0 sm:$0xff]  ;;  %s1653_s6 = smov [#allocation5]  }
 0x614   :  { %s1286_s7 = sshll.u32 %s1653_s6, 4  ;;  %s1287_s7 = int_to_ptr.vmem [resolvable:$true] %s1286_s7 }
 0x615   :  { %v1121_v2 = vadd.f32 %v1117_v61, %v1739_v4  ;;  %s1609_s2 = scalar_lea.vmem %s1287_s7, 256  ;;  %p1614_p9 = scmp.lt.s32.totalorder %s1287_s7, %s1287_s7 }
 0x616   :  { %p1610_p8 = scmp.ne.s32.totalorder %s1287_s7, %s1609_s2  ;;  %p1615_p10 = scmp.lt.s32.totalorder %s1609_s2, %s1609_s2 }
 0x617   :  { %v1122_v1 = vpack.c.bf16 %v1121_v2, %v1120_v63 }
 0x618   :  { %p1616_p11 = por %p1615_p10, %p1614_p9 }
 0x619   :  { %1495 = vmatmul.mubr.msk.bf16.vlgmr.msra.gmra.mrb[36].mxu0 %vm74_vm1, %v1122_v1 }
 0x61a   :  { %p1617_p12 = pnand %p1616_p11, %p1610_p8 }
 0x6ec   :  { %v1183_v4 = vpop.f32.mrb[36].mxu0 }
 0x6ed   :  { %v1184_v7 = vadd.f32 %v1322_v3, %v1183_v4  ;;  %v1496_v8 = vpop.f32.mrb[37].mxu0 }
 0x6ee   :  { %v1186_v9 = vpop.f32.mrb[38].mxu0 }
 0x6ef   :  { %v1187_v10 = vadd.f32 %v1322_v3, %v1186_v9  ;;  %v1497_v11 = vpop.f32.mrb[39].mxu0  ;;  %v1190_v13 = vmax.f32 %v1184_v7, 0.0 }
 0x6f1   :  { %v1191_v14 = vmax.f32 %v1187_v10, 0.0 }
 0x6f3   :  { %v1192_v15 = vpack.c.bf16 %v1191_v14, %v1190_v13 }
 0x6f5   :  { %1507 = vmatmul.mubr.msk.bf16.vlgmr.msra.gmra.mrb[36].mxu1 %vm1232_vm7, %v1192_v15 }
 0x7c8   :  { %v1270_v16 = vpop.f32.mrb[36].mxu1 }
 0x7c9   :  { %v1271_v18 = vadd.f32 %v1326_v0, %v1270_v16  ;;  %v1508_v19 = vpop.f32.mrb[37].mxu1 }
 0x7ca   :  { %v1273_v20 = vpop.f32.mrb[38].mxu1 }
 0x7cb   :  { %v1277_v21 = vadd.f32 %v1271_v18, %v1120_v63  ;;  %v1274_v22 = vadd.f32 %v1326_v0, %v1273_v20  ;;  %v1509_v23 = vpop.f32.mrb[39].mxu1 }
 0x7cd   :  { %1279 = vst.msk [vmem:[#allocation5] sm:$0xff] %vm74_vm1, %v1277_v21  ;;  %v1278_v17 = vadd.f32 %v1274_v22, %v1121_v2 }
 0x7cf   :  { %1280 = vst.msk [vmem:[#allocation5 + $0x8] sm:$0xff] %vm74_vm1, %v1278_v17 }
 0x7d0   :  { %1620 = shalt.err (!%p1617_p12)
}
 0x7d1   :  { %s1621_s14 = scalar_lea.hbm %s2005_s9, 256 }
 0x7d2   :  { %p1622_p13 = scmp.ne.s32.totalorder %s2005_s9, %s1621_s14  ;;  %p1625_p0 = scmp.lt.u32.totalorder %s1621_s14, %s2005_s9 }
 0x7d4   :  { %p1627_p1 = pnand %p1625_p0, %p1622_p13 }
 0x7d6   :  { %1630 = shalt.err (!%p1627_p1)
}
 0x7d7   :  { %s1654_s19 = smov 128  }
 0x7d8   :  { %1292 = dma.vmem_to_hbm [thread:$0]  %s1287_s7, 256, %s2005_s9, [#allocation4], %s1654_s19, %s1654_s19, %s1650_s20  }
 0x7d9   :  { %1633 = dma.done.wait [#allocation4], 256  }
 0x7da   :  { %1634 = vsyncadd [#allocation4], 4294967040 }
 0x7db   :  { %1296 = vsyncpa [#allocation3], 1 }
 0x7dc   :  { %1297 = vsyncpa [#allocation4], 1 }

</bundles_post_ra>
